<compile_context>
chip_gen: v5e
topology: v5e:2x2
jax: 0.10.0
libtpu: 0.0.40
codegen_flags: <defaults>
</compile_context>

<pallas_src>
import functools

import jax
import jax.numpy as jnp
from jax import lax
from jax.experimental import pallas as pl
from jax.experimental.pallas import tpu as pltpu

EPS = 1e-5


def _round_up(x, m):
    return (x + m - 1) // m * m


# ---------------------------------------------------------------------------
# Pass 1: tiled conv-as-matmul + per-tile partial BN statistics.
# ---------------------------------------------------------------------------
def _conv_stats_kernel(patches_ref, w_ref, y_ref, psum_ref, psq_ref):
    x = patches_ref[...]                                     # (TM, Kp) bf16
    w = w_ref[...]                                           # (Kp, Cp) bf16
    y = jnp.dot(x, w, preferred_element_type=jnp.float32)    # MXU, f32 accum
    y_ref[...] = y

    s = jnp.sum(y, axis=0, keepdims=True)                    # (1, Cp)
    sq = jnp.sum(y * y, axis=0, keepdims=True)               # (1, Cp)
    # Partial stats written as full sublane-aligned (8, Cp) blocks; the
    # wrapper reads row 0 of each tile's block.
    psum_ref[...] = jnp.broadcast_to(s, psum_ref.shape)
    psq_ref[...] = jnp.broadcast_to(sq, psq_ref.shape)


# ---------------------------------------------------------------------------
# Pass 2: elementwise BN affine (precomputed scale/shift) + PReLU.
# ---------------------------------------------------------------------------
def _bn_prelu_kernel(y_ref, scale_ref, shift_ref, alpha_ref, out_ref, *,
                     use_relu: bool):
    y = y_ref[...]                                           # (TM, Cp) f32
    z = y * scale_ref[...] + shift_ref[...]
    if use_relu:
        alpha = alpha_ref[0]                                 # scalar from SMEM
        z = jnp.where(z > 0, z, alpha * z)
    out_ref[...] = z.astype(out_ref.dtype)


def _im2col(x, KH, KW, stride, dilation, padding):
    """x: (N, Cin, H, W) -> (N*OH*OW, Cin*KH*KW); column order matches
    PyTorch weight.reshape(Cout, Cin*KH*KW) flattening (Cin, KH, KW)."""
    N, C, H, W = x.shape
    xp = jnp.pad(x, ((0, 0), (0, 0), (padding, padding), (padding, padding)))
    OH = (H + 2 * padding - dilation * (KH - 1) - 1) // stride + 1
    OW = (W + 2 * padding - dilation * (KW - 1) - 1) // stride + 1
    cols = []
    for kh in range(KH):
        for kw in range(KW):
            h0 = kh * dilation
            w0 = kw * dilation
            patch = xp[:, :,
                       h0:h0 + stride * (OH - 1) + 1:stride,
                       w0:w0 + stride * (OW - 1) + 1:stride]   # (N, C, OH, OW)
            cols.append(patch)
    col = jnp.stack(cols, axis=0).reshape(KH, KW, N, C, OH, OW)
    col = col.transpose(2, 4, 5, 3, 0, 1).reshape(N * OH * OW, C * KH * KW)
    return col, OH, OW


def conv_bn_relu(x, weight, gamma, beta, alpha, *,
                 stride=1, padding=0, dilation=1, use_relu=True, tm=256):
    """x: (N, Cin, H, W), weight: (Cout, Cin, KH, KW) -> (N, Cout, OH, OW)."""
    N, Cin, H, W = x.shape
    Cout, _, KH, KW = weight.shape

    col, OH, OW = _im2col(x, KH, KW, stride, dilation, padding)   # (M, K) f32
    M, K = col.shape

    # Lane/MXU-friendly padded sizes.
    Kp = _round_up(K, 128)
    Cp = _round_up(Cout, 128)
    tm = min(tm, _round_up(M, 16))          # tile rows (multiple of 16 for bf16)
    Mp = _round_up(M, tm)
    nt = Mp // tm

    # bf16 operands for the MXU (also halves patch-matrix HBM traffic).
    # TODO(synk): fold im2col into the kernel (grid over kh,kw with shifted
    # index_maps on a padded NHWC input) to avoid materializing the KH*KW-fold
    # duplicated patch matrix in HBM at all.
    col_p = jnp.zeros((Mp, Kp), jnp.bfloat16).at[:M, :K].set(
        col.astype(jnp.bfloat16))
    w2d = weight.reshape(Cout, Cin * KH * KW).T                   # (K, Cout)
    w_p = jnp.zeros((Kp, Cp), jnp.bfloat16).at[:K, :Cout].set(
        w2d.astype(jnp.bfloat16))

    flops = 2 * Mp * Kp * Cp
    bytes_accessed = (Mp * Kp * 2 + Kp * Cp * 2 + Mp * Cp * 4
                      + 2 * nt * 8 * Cp * 4)

    # ---- Pass 1: tiled matmul + partial BN stats -------------------------
    y, psum, psq = pl.pallas_call(
        _conv_stats_kernel,
        out_shape=(
            jax.ShapeDtypeStruct((Mp, Cp), jnp.float32),       # y
            jax.ShapeDtypeStruct((nt * 8, Cp), jnp.float32),   # partial sums
            jax.ShapeDtypeStruct((nt * 8, Cp), jnp.float32),   # partial sumsq
        ),
        grid=(nt,),
        in_specs=[
            pl.BlockSpec((tm, Kp), lambda i: (i, 0)),   # patches tile (pipelined)
            pl.BlockSpec((Kp, Cp), lambda i: (0, 0)),   # weight, resident
        ],
        out_specs=(
            pl.BlockSpec((tm, Cp), lambda i: (i, 0)),
            pl.BlockSpec((8, Cp), lambda i: (i, 0)),
            pl.BlockSpec((8, Cp), lambda i: (i, 0)),
        ),
        compiler_params=pltpu.CompilerParams(
            dimension_semantics=("parallel",),
            vmem_limit_bytes=32 * 1024 * 1024),
        cost_estimate=pl.CostEstimate(
            flops=flops, transcendentals=0, bytes_accessed=bytes_accessed),
    )(col_p, w_p)

    # ---- Combine partial stats -> full-batch BN scale/shift (tiny glue) --
    total_sum = psum.reshape(nt, 8, Cp)[:, 0, :].sum(axis=0)       # (Cp,)
    total_sq = psq.reshape(nt, 8, Cp)[:, 0, :].sum(axis=0)         # (Cp,)
    mean = total_sum / M
    var = jnp.maximum(total_sq / M - mean * mean, 0.0)             # biased var
    gamma_p = jnp.zeros((Cp,), jnp.float32).at[:Cout].set(
        gamma.astype(jnp.float32))
    beta_p = jnp.zeros((Cp,), jnp.float32).at[:Cout].set(
        beta.astype(jnp.float32))
    scale = (gamma_p * lax.rsqrt(var + EPS)).reshape(1, Cp)
    shift = (beta_p.reshape(1, Cp) - mean.reshape(1, Cp) * scale)
    alpha1 = jnp.asarray(alpha, jnp.float32).reshape(1)

    # ---- Pass 2: tiled elementwise BN affine + PReLU ---------------------
    kernel2 = functools.partial(_bn_prelu_kernel, use_relu=use_relu)
    out = pl.pallas_call(
        kernel2,
        out_shape=jax.ShapeDtypeStruct((Mp, Cp), jnp.float32),
        grid=(nt,),
        in_specs=[
            pl.BlockSpec((tm, Cp), lambda i: (i, 0)),              # y tile
            pl.BlockSpec((1, Cp), lambda i: (0, 0)),               # scale
            pl.BlockSpec((1, Cp), lambda i: (0, 0)),               # shift
            pl.BlockSpec(memory_space=pltpu.MemorySpace.SMEM),     # PReLU alpha
        ],
        out_specs=pl.BlockSpec((tm, Cp), lambda i: (i, 0)),
        compiler_params=pltpu.CompilerParams(
            dimension_semantics=("parallel",),
            vmem_limit_bytes=32 * 1024 * 1024),
    )(y, scale, shift, alpha1)

    return out[:M, :Cout].reshape(N, OH, OW, Cout).transpose(0, 3, 1, 2)


def _reference(x, weight, gamma, beta, alpha, *, stride, padding, dilation,
               use_relu):
    y = lax.conv_general_dilated(
        x, weight, window_strides=(stride, stride),
        padding=((padding, padding), (padding, padding)),
        rhs_dilation=(dilation, dilation),
        dimension_numbers=("NCHW", "OIHW", "NCHW"))
    mean = y.mean(axis=(0, 2, 3), keepdims=True)
    var = ((y - mean) ** 2).mean(axis=(0, 2, 3), keepdims=True)   # biased
    z = (y - mean) / jnp.sqrt(var + EPS)
    z = z * gamma.reshape(1, -1, 1, 1) + beta.reshape(1, -1, 1, 1)
    if use_relu:
        z = jnp.where(z > 0, z, alpha * z)
    return z


if __name__ == "__main__":
    # ConvBNRelu(in_planes=4, out_planes=8, kernel_size=3, stride=1, padding=1)
    N, Cin, H, W = 2, 4, 16, 16
    Cout, KH, KW = 8, 3, 3
    stride, padding, dilation = 1, 1, 1

    key = jax.random.PRNGKey(0)
    kx, kw, kg, kb = jax.random.split(key, 4)

    x = jax.random.normal(kx, (N, Cin, H, W), dtype=jnp.float32)
    weight = jax.random.normal(kw, (Cout, Cin, KH, KW), dtype=jnp.float32) * 0.1
    gamma = 1.0 + 0.1 * jax.random.normal(kg, (Cout,), dtype=jnp.float32)
    beta = 0.1 * jax.random.normal(kb, (Cout,), dtype=jnp.float32)
    alpha = 0.25  # nn.PReLU() default init

    out = conv_bn_relu(x, weight, gamma, beta, alpha,
                       stride=stride, padding=padding, dilation=dilation,
                       use_relu=True)
    out = jax.block_until_ready(out)

    ref = _reference(x, weight, gamma, beta, alpha,
                     stride=stride, padding=padding, dilation=dilation,
                     use_relu=True)
    assert out.shape == (N, Cout, H, W)
    # bf16 MXU operands -> looser tolerance than the pure-f32 reference.
    assert jnp.allclose(out, ref, atol=5e-2, rtol=5e-2), \
        float(jnp.max(jnp.abs(out - ref)))

    print("KERNEL_OK")
</pallas_src>

<mosaic_0001>
module attributes {stable_mosaic.version = 11 : i64} {
  func.func @_conv_stats_kernel(%arg0: i32, %arg1: memref<256x128xbf16, #tpu.memory_space<vmem>>, %arg2: memref<128x128xbf16, #tpu.memory_space<vmem>>, %arg3: memref<256x128xf32, #tpu.memory_space<vmem>>, %arg4: memref<8x128xf32, #tpu.memory_space<vmem>>, %arg5: memref<8x128xf32, #tpu.memory_space<vmem>>) attributes {dimension_semantics = [#tpu.dimension_semantics<parallel>], iteration_bounds = array<i64: 2>, scalar_prefetch = 0 : i64, scratch_operands = 0 : i64, tpu.core_type = #tpu.core_type<tc>, window_params = [{transform_indices = @transform_0, window_bounds = array<i64: 256, 128>}, {pipeline_mode = #tpu.pipeline_mode<synchronous>, transform_indices = @transform_1, window_bounds = array<i64: 128, 128>}, {transform_indices = @transform_2, window_bounds = array<i64: 256, 128>}, {transform_indices = @transform_3, window_bounds = array<i64: 8, 128>}, {transform_indices = @transform_4, window_bounds = array<i64: 8, 128>}]} {
    %c0 = arith.constant 0 : index
    %c0_0 = arith.constant 0 : index
    %0 = vector.load %arg1[%c0, %c0_0] : memref<256x128xbf16, #tpu.memory_space<vmem>>, vector<256x128xbf16>
    %c0_1 = arith.constant 0 : index
    %c0_2 = arith.constant 0 : index
    %1 = vector.load %arg2[%c0_1, %c0_2] : memref<128x128xbf16, #tpu.memory_space<vmem>>, vector<128x128xbf16>
    %cst = arith.constant dense<0.000000e+00> : vector<256x128xf32>
    %2 = tpu.matmul %0, %1, %cst {dimension_numbers = #tpu.dot_dimension_numbers<[1], [0], [0], [1], [0, 0, 1, 1], [], []>} : vector<256x128xbf16>, vector<128x128xbf16>, vector<256x128xf32> -> vector<256x128xf32>
    %c0_3 = arith.constant 0 : index
    %c0_4 = arith.constant 0 : index
    %3 = vector.load %arg3[%c0_3, %c0_4] : memref<256x128xf32, #tpu.memory_space<vmem>>, vector<256x128xf32>
    tpu.vector_store %arg3[%c0_3, %c0_4], %2 {strides = array<i32>} : memref<256x128xf32, #tpu.memory_space<vmem>>, vector<256x128xf32>,
    %cst_5 = arith.constant dense<0.000000e+00> : vector<128xf32>
    %4 = vector.multi_reduction <add>, %2, %cst_5 [0] : vector<256x128xf32> to vector<128xf32>
    %5 = vector.shape_cast %4 : vector<128xf32> to vector<1x128xf32>
    %6 = arith.mulf %2, %2 : vector<256x128xf32>
    %cst_6 = arith.constant dense<0.000000e+00> : vector<128xf32>
    %7 = vector.multi_reduction <add>, %6, %cst_6 [0] : vector<256x128xf32> to vector<128xf32>
    %8 = vector.shape_cast %7 : vector<128xf32> to vector<1x128xf32>
    %9 = vector.shape_cast %5 : vector<1x128xf32> to vector<1x128xf32>
    %10 = vector.broadcast %9 : vector<1x128xf32> to vector<8x128xf32>
    %c0_7 = arith.constant 0 : index
    %c0_8 = arith.constant 0 : index
    %11 = vector.load %arg4[%c0_7, %c0_8] : memref<8x128xf32, #tpu.memory_space<vmem>>, vector<8x128xf32>
    tpu.vector_store %arg4[%c0_7, %c0_8], %10 {strides = array<i32>} : memref<8x128xf32, #tpu.memory_space<vmem>>, vector<8x128xf32>,
    %12 = vector.shape_cast %8 : vector<1x128xf32> to vector<1x128xf32>
    %13 = vector.broadcast %12 : vector<1x128xf32> to vector<8x128xf32>
    %c0_9 = arith.constant 0 : index
    %c0_10 = arith.constant 0 : index
    %14 = vector.load %arg5[%c0_9, %c0_10] : memref<8x128xf32, #tpu.memory_space<vmem>>, vector<8x128xf32>
    tpu.vector_store %arg5[%c0_9, %c0_10], %13 {strides = array<i32>} : memref<8x128xf32, #tpu.memory_space<vmem>>, vector<8x128xf32>,
    return
  }
  func.func @transform_0(%arg0: i32) -> (i32, i32) {
    %c0_i32 = arith.constant 0 : i32
    %c0_i32_0 = arith.constant 0 : i32
    return %arg0, %c0_i32 : i32, i32
  }
  func.func @transform_1(%arg0: i32) -> (i32, i32) {
    %c0_i32 = arith.constant 0 : i32
    %c0_i32_0 = arith.constant 0 : i32
    %c0_i32_1 = arith.constant 0 : i32
    return %c0_i32, %c0_i32_0 : i32, i32
  }
  func.func @transform_2(%arg0: i32) -> (i32, i32) {
    %c0_i32 = arith.constant 0 : i32
    %c0_i32_0 = arith.constant 0 : i32
    return %arg0, %c0_i32 : i32, i32
  }
  func.func @transform_3(%arg0: i32) -> (i32, i32) {
    %c0_i32 = arith.constant 0 : i32
    %c0_i32_0 = arith.constant 0 : i32
    return %arg0, %c0_i32 : i32, i32
  }
  func.func @transform_4(%arg0: i32) -> (i32, i32) {
    %c0_i32 = arith.constant 0 : i32
    %c0_i32_0 = arith.constant 0 : i32
    return %arg0, %c0_i32 : i32, i32
  }
}

</mosaic_0001>

<bundles_post_ra>
// kernel: tpu_custom_call.1
= control target key start
LH: loop header
LB: loop body
LE: loop exit
PB: predicated region body
PF: predicated region fallthrough
CT: control target
= control target key end

     0   :  { %10 = vsyncpa [#allocation3], 0  ;;  %s1710_s0 = inlined_call_operand.hbm [shape: bf16[512,128], index: 0, kind: input, shape index: {}]   ;;  %s1711_s1 = inlined_call_operand.hbm [shape: bf16[128,128], index: 1, kind: input, shape index: {}]   ;;  %s1712_s2 = inlined_call_operand.hbm [shape: f32[512,128], index: 2, kind: output, shape index: {0}]   ;;  %s1713_s3 = inlined_call_operand.hbm [shape: f32[16,128], index: 3, kind: output, shape index: {1}]   ;;  %s1714_s4 = inlined_call_operand.hbm [shape: f32[16,128], index: 4, kind: output, shape index: {2}]  }
   0x1   :  { %12 = vsyncpa [#allocation3 + $0x1], 0 }
   0x2   :  { %13 = vsyncpa [#allocation6], 0 }
   0x3   :  { %14 = vsyncpa [#allocation4], 0 }
   0x4   :  { %16 = vsyncpa [#allocation4 + $0x1], 0 }
   0x5   :  { %17 = vsyncpa [#allocation9], 0 }
   0x6   :  { %19 = vsyncpa [#allocation9 + $0x1], 0  ;;  %s1337_s15 = smov 0   ;;  %s1339_s16 = smov 0  }
   0x7   :  { %s1341_s17 = smov 0   ;;  %s1343_s18 = smov 0  }
   0x8 LB: > { %s1358_s19 = sadd.s32 4294967295, %s1305_s18   ;;  %s1715_s20 = sadd.s32 4294967294, %s1305_s18   ;;  %s1305_s18 = sphi %s1343_s18, %s1726_s18   ;;  %s1301_s17 = sphi %s1341_s17, %s1725_s17   ;;  %s1297_s16 = sphi %s1339_s16, %s1724_s16   ;;  %s1293_s15 = sphi %s1337_s15, %s1723_s15  }
   0x9   : > { %p45_p0 = scmp.ne.s32.totalorder %s1297_s16, %s1293_s15  ;;  %p46_p1 = scmp.eq.s32.totalorder %s1358_s19, 0 }
   0xa   : > { %p90_p2 = scmp.eq.s32.totalorder %s1358_s19, 1  ;;  %p96_p3 = scmp.eq.s32.totalorder %s1715_s20, 1 }
   0xb   : > { %p1369_p4 = por %p46_p1, %p45_p0  ;;  %p877_p5 = scmp.ge.s32.totalorder %s1305_s18, 1 }
   0xc   : > { %p1374_p6 = por %p96_p3, %p45_p0  ;;  %p155_p7 = scmp.lt.s32.totalorder %s1305_s18, 3 }
   0xd   : > { %s166_s25 = sshll.u32 %s1711_s1, 4  ;;  %s1307_s27 = smov [#allocation5]   ;;  %s167_s25 = int_to_ptr.hbm [resolvable:$true] %s166_s25 }
   0xe   : > { %p1382_p8 = pnand %p877_p5, %p155_p7  ;;  %s168_s28 = sshll.u32 %s1307_s27, 4  ;;  %s169_s28 = int_to_ptr.vmem [resolvable:$true] %s168_s28 }
   0xf   : > { %s1392_s29 = sadd.s32 1, %s1305_s18   ;;  %s1308_s30 = smov 64  }
  0x10   : > { %p1056_p9 = pneg %p1382_p8  ;;  %s1309_s5 = smov 4  }
  0x11   : > { %s29_s6 = ssub.s32 %s1305_s18, %s1392_s29  ;;  %s32_s7 = sadd.s32 1, %s1301_s17 }
  0x12   : > { %p1057_p10 = pnand %p1056_p9, %p46_p1  ;;  %p30_p12 = scmp.eq.s32.totalorder %s29_s6, 0 }
  0x13   : > { %p39_p13 = scmp.ne.s32.totalorder %s1301_s17, %s1297_s16  ;;  %p40_p0 = scmp.eq.s32.totalorder %s1305_s18, 0 }
  0x14   : > { %1059 = dma.hbm_to_vmem [thread:$0]  (!%p1057_p10), %s167_s25, 1024, %s169_s28, [#allocation6], %s1308_s30, %s1308_s30, %s1309_s5  }
  0x15   : > { %s1404_s8 = scalar_select %p30_p12, %s1301_s17, %s32_s7  }
  0x16   : > { %p1408_p3 = por %p90_p2, %p39_p13  ;;  %p1075_p5 = scmp.lt.s32.totalorder %s1305_s18, 2 }
  0x17   : > { %s182_s10 = sand.u32 1, %s1301_s17   ;;  %s994_s11 = sshll.u32 %s1305_s18, 7 }
  0x18   : > { %p41_p7 = por %p40_p0, %p39_p13  ;;  %s880_s12 = sshll.u32 %s182_s10, 7 }
  0x19   : > { %s191_s23 = scalar_lea.hbm %s1710_s0, %s994_s11  ;;  %s186_s25 = scalar_lea.vmem [#allocation2], %s880_s12 }
  0x1a   : > { %s192_s24 = sshll.u32 %s191_s23, 4  ;;  %s194_s27 = sshll.u32 %s186_s25, 4  ;;  %s193_s24 = int_to_ptr.hbm [resolvable:$true] %s192_s24  ;;  %s195_s27 = int_to_ptr.vmem [resolvable:$true] %s194_s27 }
  0x1b   : > { %p1418_p9 = pnand %p1075_p5, %p41_p7  ;;  %s183_s6 = scalar_lea.sflag [#allocation3], %s182_s10 }
  0x1c   : > { %s1145_s7 = sshra.s32 %s193_s24, 4  ;;  %s1152_s12 = scalar_lea.hbm %s1710_s0, 256  ;;  %s1146_s7 = int_to_ptr.hbm [resolvable:$true] %s1145_s7 }
  0x1d   : > { %s1147_s20 = scalar_lea.hbm %s1146_s7, 128  ;;  %p1149_p10 = pneg %p1418_p9 }
  0x1e   : > { %p1148_p2 = scmp.ne.s32.totalorder %s1146_s7, %s1147_s20  ;;  %p1153_p0 = scmp.lt.s32.totalorder %s1146_s7, %s1710_s0 }
  0x1f   : > { %p1154_p5 = scmp.lt.s32.totalorder %s1152_s12, %s1147_s20 }
  0x20   : > { %p1150_p12 = pnand %p1149_p10, %p1148_p2 }
  0x21   : > { %p1155_p7 = por %p1154_p5, %p1153_p0 }
  0x22   : > { %p1151_p13 = pneg %p1150_p12 }
  0x24   : > { %p1156_p11 = pnand %p1155_p7, %p1151_p13 }
  0x26   : > { %1159 = shalt.err (!%p1156_p11)
}
  0x27   : > { %1063 = dma.hbm_to_vmem [thread:$0]  (!%p1418_p9), %s193_s24, 2048, %s195_s27, %s183_s6, %s1308_s30, %s1308_s30, %s1309_s5  }
  0x28   : > { %206 = sbr.rel (%p1382_p8) target bundleno = 339 (0x153), region = 28  ;;  %s1438_s10 = sand.u32 (!%p1382_p8), 1, %s1297_s16  }
  0x29   : > { %s884_s25 = sshll.u32 (!%p1382_p8), %s1438_s10, 7  ;;  %s209_s20 = scalar_lea.sflag (!%p1382_p8), [#allocation3], %s1438_s10 }
  0x2a   : > { %s1442_s7 = scalar_lea.vmem (!%p1382_p8), [#allocation2], %s884_s25 }
  0x2d   : > { %1276 = dma.done.wait (%p1369_p4), %s209_s20, 2048  }
  0x2e   : > { %1278 = vsyncadd (%p1369_p4), %s209_s20, 4294965248 }
  0x2f   : > { %1280 = dma.done.wait (%p46_p1), [#allocation6], 1024  }
  0x30   : > { %1282 = vsyncadd (%p46_p1), [#allocation6], 4294966272  ;;  %v1018_v0 = vld [vmem:[#allocation5 + $0x38] sm:$0xff]  ;;  %v1017_v1 = vld [vmem:[#allocation5 + $0x30] sm:$0xff]  ;;  %s886_s21 = sshll.u32 %s1438_s10, 8  ;;  %s1019_s30 = sshll.u32 %s1358_s19, 8 }
  0x31   : > { %447 = vmatpush.bf16.msra.mxu0 %v1018_v0  ;;  %1020 = vmatpush.bf16.msra.mxu1 %v1018_v0  ;;  %v1016_v2 = vld [vmem:[#allocation5 + $0x28] sm:$0xff]  ;;  %v1015_v3 = vld [vmem:[#allocation5 + $0x20] sm:$0xff]  ;;  %v1014_v4 = vld [vmem:[#allocation5 + $0x18] sm:$0xff]  ;;  %s1471_s26 = scalar_lea.vmem [#allocation7], %s886_s21  ;;  %s698_s27 = scalar_lea.hbm %s1712_s2, %s1019_s30 }
  0x32   : > { %1021 = vmatpush.bf16.msra.mxu2 %v1018_v0  ;;  %1022 = vmatpush.bf16.msra.mxu3 %v1018_v0  ;;  %v1013_v5 = vld [vmem:[#allocation5 + $0x10] sm:$0xff]  ;;  %v1012_v6 = vld [vmem:[#allocation5 + $0x8] sm:$0xff]  ;;  %v1011_v7 = vld [vmem:[#allocation5] sm:$0xff]  ;;  %s699_s28 = sshll.u32 %s1471_s26, 4  ;;  %s701_s6 = sshll.u32 %s698_s27, 4  ;;  %s1578_s28 = int_to_ptr.vmem [resolvable:$true] %s699_s28  ;;  %s702_s6 = int_to_ptr.hbm [resolvable:$true] %s701_s6 }
  0x33   : > { %v995_v8 = vld [vmem:[%s1442_s7] sm:$0xff]  ;;  %v996_v12 = vld [vmem:[%s1442_s7 + $0x8] sm:$0xff]  ;;  %v997_v16 = vld [vmem:[%s1442_s7 + $0x10] sm:$0xff]  ;;  %s677_s11 = scalar_lea.sflag [#allocation4], %s1438_s10  ;;  %s1189_s13 = sshra.s32 %s702_s6, 4  ;;  %s1190_s13 = int_to_ptr.hbm [resolvable:$true] %s1189_s13 }
  0x34   : > { %v999_v9 = vld [vmem:[%s1442_s7 + $0x20] sm:$0xff]  ;;  %v1000_v13 = vld [vmem:[%s1442_s7 + $0x28] sm:$0xff]  ;;  %v1001_v17 = vld [vmem:[%s1442_s7 + $0x30] sm:$0xff]  ;;  %s1191_s12 = scalar_lea.hbm %s1190_s13, 256  ;;  %s1195_s25 = scalar_lea.hbm %s1712_s2, 512 }
  0x35   : > { %448 = vmatpush.bf16.msra.mxu0 %v1017_v1  ;;  %1023 = vmatpush.bf16.msra.mxu1 %v1017_v1  ;;  %v1003_v10 = vld [vmem:[%s1442_s7 + $0x40] sm:$0xff]  ;;  %v1004_v14 = vld [vmem:[%s1442_s7 + $0x48] sm:$0xff]  ;;  %v1005_v18 = vld [vmem:[%s1442_s7 + $0x50] sm:$0xff]  ;;  %p1192_p1 = scmp.ne.s32.totalorder %s1190_s13, %s1191_s12  ;;  %p1196_p11 = scmp.lt.s32.totalorder %s1190_s13, %s1712_s2 }
  0x36   : > { %1024 = vmatpush.bf16.msra.mxu2 %v1017_v1  ;;  %1025 = vmatpush.bf16.msra.mxu3 %v1017_v1  ;;  %v1007_v11 = vld [vmem:[%s1442_s7 + $0x60] sm:$0xff]  ;;  %v1008_v15 = vld [vmem:[%s1442_s7 + $0x68] sm:$0xff]  ;;  %v1009_v19 = vld [vmem:[%s1442_s7 + $0x70] sm:$0xff]  ;;  %p1197_p9 = scmp.lt.s32.totalorder %s1195_s25, %s1191_s12 }
  0x37   : > { %v998_v20 = vld [vmem:[%s1442_s7 + $0x18] sm:$0xff]  ;;  %p1193_p4 = pnand %p1192_p1, %p1408_p3 }
  0x38   : > { %v1002_v21 = vld [vmem:[%s1442_s7 + $0x38] sm:$0xff]  ;;  %p1198_p2 = por %p1197_p9, %p1196_p11 }
  0x39   : > { %449 = vmatpush.bf16.msra.mxu0 %v1016_v2  ;;  %1026 = vmatpush.bf16.msra.mxu1 %v1016_v2  ;;  %v1006_v22 = vld [vmem:[%s1442_s7 + $0x58] sm:$0xff]  ;;  %p1194_p8 = pneg %p1193_p4 }
  0x3a   : > { %1027 = vmatpush.bf16.msra.mxu2 %v1016_v2  ;;  %1028 = vmatpush.bf16.msra.mxu3 %v1016_v2  ;;  %v1010_v23 = vld [vmem:[%s1442_s7 + $0x78] sm:$0xff] }
  0x3b   : > { %p1199_p10 = pnand %p1198_p2, %p1194_p8 }
  0x3d   : > { %450 = vmatpush.bf16.msra.mxu0 %v1015_v3  ;;  %1029 = vmatpush.bf16.msra.mxu1 %v1015_v3 }
  0x3e   : > { %1030 = vmatpush.bf16.msra.mxu2 %v1015_v3  ;;  %1031 = vmatpush.bf16.msra.mxu3 %v1015_v3 }
  0x41   : > { %451 = vmatpush.bf16.msra.mxu0 %v1014_v4  ;;  %1032 = vmatpush.bf16.msra.mxu1 %v1014_v4 }
  0x42   : > { %1033 = vmatpush.bf16.msra.mxu2 %v1014_v4  ;;  %1034 = vmatpush.bf16.msra.mxu3 %v1014_v4 }
  0x45   : > { %452 = vmatpush.bf16.msra.mxu0 %v1013_v5  ;;  %1035 = vmatpush.bf16.msra.mxu1 %v1013_v5 }
  0x46   : > { %1036 = vmatpush.bf16.msra.mxu2 %v1013_v5  ;;  %1037 = vmatpush.bf16.msra.mxu3 %v1013_v5 }
  0x49   : > { %453 = vmatpush.bf16.msra.mxu0 %v1012_v6  ;;  %1038 = vmatpush.bf16.msra.mxu1 %v1012_v6 }
  0x4a   : > { %1039 = vmatpush.bf16.msra.mxu2 %v1012_v6  ;;  %1040 = vmatpush.bf16.msra.mxu3 %v1012_v6 }
  0x4d   : > { %454 = vmatpush.bf16.msra.mxu0 %v1011_v7  ;;  %1041 = vmatpush.bf16.msra.mxu1 %v1011_v7 }
  0x4e   : > { %1042 = vmatpush.bf16.msra.mxu2 %v1011_v7  ;;  %1043 = vmatpush.bf16.msra.mxu3 %v1011_v7 }
  0x50   : > { %455 = vmatmul.bf16.vlgmr.msra.gmra.mxu0 %v995_v8  ;;  %475 = vmatmul.bf16.vlgmr.msra.gmra.mxu1 %v999_v9 }
  0x51   : > { %495 = vmatmul.bf16.vlgmr.msra.gmra.mxu2 %v1003_v10  ;;  %515 = vmatmul.bf16.vlgmr.msra.gmra.mxu3 %v1007_v11 }
  0x60   : > { %460 = vmatmul.bf16.gmra.mxu0 %v996_v12  ;;  %480 = vmatmul.bf16.gmra.mxu1 %v1000_v13 }
  0x61   : > { %500 = vmatmul.bf16.gmra.mxu2 %v1004_v14  ;;  %520 = vmatmul.bf16.gmra.mxu3 %v1008_v15 }
  0x70   : > { %465 = vmatmul.bf16.gmra.mxu0 %v997_v16  ;;  %485 = vmatmul.bf16.gmra.mxu1 %v1001_v17 }
  0x71   : > { %505 = vmatmul.bf16.gmra.mxu2 %v1005_v18  ;;  %525 = vmatmul.bf16.gmra.mxu3 %v1009_v19 }
  0x80   : > { %470 = vmatmul.bf16.gmra.mxu0 %v998_v20  ;;  %490 = vmatmul.bf16.gmra.mxu1 %v1002_v21 }
  0x81   : > { %510 = vmatmul.bf16.gmra.mxu2 %v1006_v22  ;;  %530 = vmatmul.bf16.gmra.mxu3 %v1010_v23 }
  0xcd   : > { %v456_v24 = vpop.f32.mrf.mxu0  ;;  %v1469_v25 = vpop.f32.mrf.mxu1 }
  0xce   : > { %536 = vst [vmem:[%s1471_s26] sm:$0xff] %v456_v24  ;;  %v605_v47 = vmul.f32 %v456_v24, %v456_v24  ;;  %v613_v11 = vmul.f32 %v1469_v25, %v1469_v25 }
  0xcf   : > { %544 = vst [vmem:[%s1471_s26 + $0x40] sm:$0xff] %v1469_v25 }
  0xd4   : > { %v1476_v26 = vpop.f32.mrf.mxu2  ;;  %v1483_v29 = vpop.f32.mrf.mxu3 }
  0xd5   : > { %v458_v27 = vpop.f32.mrf.mxu0  ;;  %v1478_v28 = vpop.f32.mrf.mxu1  ;;  %552 = vst [vmem:[%s1471_s26 + $0x80] sm:$0xff] %v1476_v26 }
  0xd6   : > { %537 = vst [vmem:[%s1471_s26 + $0x8] sm:$0xff] %v458_v27  ;;  %v606_v46 = vmul.f32 %v458_v27, %v458_v27  ;;  %v568_v48 = vadd.f32 %v458_v27, %v456_v24  ;;  %v614_v14 = vmul.f32 %v1478_v28, %v1478_v28 }
  0xd7   : > { %545 = vst [vmem:[%s1471_s26 + $0x48] sm:$0xff] %v1478_v28 }
  0xd8   : > { %560 = vst [vmem:[%s1471_s26 + $0xc0] sm:$0xff] %v1483_v29  ;;  %v637_v50 = vadd.f32 %v606_v46, %v605_v47 }
  0xdc   : > { %v1489_v30 = vpop.f32.mrf.mxu2  ;;  %v1496_v33 = vpop.f32.mrf.mxu3 }
  0xdd   : > { %v461_v31 = vpop.f32.mrf.mxu0  ;;  %v1491_v32 = vpop.f32.mrf.mxu1  ;;  %553 = vst [vmem:[%s1471_s26 + $0x88] sm:$0xff] %v1489_v30 }
  0xde   : > { %538 = vst [vmem:[%s1471_s26 + $0x10] sm:$0xff] %v461_v31  ;;  %v607_v49 = vmul.f32 %v461_v31, %v461_v31  ;;  %v569_v51 = vadd.f32 %v568_v48, %v461_v31  ;;  %v615_v17 = vmul.f32 %v1491_v32, %v1491_v32 }
  0xdf   : > { %546 = vst [vmem:[%s1471_s26 + $0x50] sm:$0xff] %v1491_v32 }
  0xe0   : > { %561 = vst [vmem:[%s1471_s26 + $0xc8] sm:$0xff] %v1496_v33  ;;  %v638_v56 = vadd.f32 %v637_v50, %v607_v49 }
  0xe4   : > { %v1502_v34 = vpop.f32.mrf.mxu2  ;;  %v1509_v37 = vpop.f32.mrf.mxu3 }
  0xe5   : > { %v463_v35 = vpop.f32.mrf.mxu0  ;;  %v1504_v36 = vpop.f32.mrf.mxu1  ;;  %554 = vst [vmem:[%s1471_s26 + $0x90] sm:$0xff] %v1502_v34 }
  0xe6   : > { %539 = vst [vmem:[%s1471_s26 + $0x18] sm:$0xff] %v463_v35  ;;  %v608_v52 = vmul.f32 %v463_v35, %v463_v35  ;;  %v570_v57 = vadd.f32 %v569_v51, %v463_v35  ;;  %v616_v21 = vmul.f32 %v1504_v36, %v1504_v36 }
  0xe7   : > { %547 = vst [vmem:[%s1471_s26 + $0x58] sm:$0xff] %v1504_v36 }
  0xe8   : > { %562 = vst [vmem:[%s1471_s26 + $0xd0] sm:$0xff] %v1509_v37  ;;  %v639_v60 = vadd.f32 %v638_v56, %v608_v52 }
  0xec   : > { %v1515_v38 = vpop.f32.mrf.mxu2  ;;  %v1522_v41 = vpop.f32.mrf.mxu3 }
  0xed   : > { %v466_v39 = vpop.f32.mrf.mxu0  ;;  %v1517_v40 = vpop.f32.mrf.mxu1  ;;  %555 = vst [vmem:[%s1471_s26 + $0x98] sm:$0xff] %v1515_v38 }
  0xee   : > { %540 = vst [vmem:[%s1471_s26 + $0x20] sm:$0xff] %v466_v39  ;;  %v609_v58 = vmul.f32 %v466_v39, %v466_v39  ;;  %v571_v61 = vadd.f32 %v570_v57, %v466_v39 }
  0xef   : > { %548 = vst [vmem:[%s1471_s26 + $0x60] sm:$0xff] %v1517_v40 }
  0xf0   : > { %563 = vst [vmem:[%s1471_s26 + $0xd8] sm:$0xff] %v1522_v41  ;;  %v640_v63 = vadd.f32 %v639_v60, %v609_v58 }
  0xf4   : > { %v1528_v42 = vpop.f32.mrf.mxu2  ;;  %v1535_v45 = vpop.f32.mrf.mxu3 }
  0xf5   : > { %v468_v43 = vpop.f32.mrf.mxu0  ;;  %v1530_v44 = vpop.f32.mrf.mxu1  ;;  %556 = vst [vmem:[%s1471_s26 + $0xa0] sm:$0xff] %v1528_v42 }
  0xf6   : > { %541 = vst [vmem:[%s1471_s26 + $0x28] sm:$0xff] %v468_v43  ;;  %v610_v62 = vmul.f32 %v468_v43, %v468_v43  ;;  %v572_v0 = vadd.f32 %v571_v61, %v468_v43 }
  0xf7   : > { %549 = vst [vmem:[%s1471_s26 + $0x68] sm:$0xff] %v1530_v44 }
  0xf8   : > { %564 = vst [vmem:[%s1471_s26 + $0xe0] sm:$0xff] %v1535_v45  ;;  %v641_v2 = vadd.f32 %v640_v63, %v610_v62 }
  0xfc   : > { %v1541_v53 = vpop.f32.mrf.mxu2  ;;  %v1548_v59 = vpop.f32.mrf.mxu3 }
  0xfd   : > { %v471_v54 = vpop.f32.mrf.mxu0  ;;  %v1543_v55 = vpop.f32.mrf.mxu1  ;;  %557 = vst [vmem:[%s1471_s26 + $0xa8] sm:$0xff] %v1541_v53 }
  0xfe   : > { %542 = vst [vmem:[%s1471_s26 + $0x30] sm:$0xff] %v471_v54  ;;  %v611_v1 = vmul.f32 %v471_v54, %v471_v54  ;;  %v573_v3 = vadd.f32 %v572_v0, %v471_v54 }
  0xff   : > { %550 = vst [vmem:[%s1471_s26 + $0x70] sm:$0xff] %v1543_v55 }
 0x100   : > { %565 = vst [vmem:[%s1471_s26 + $0xe8] sm:$0xff] %v1548_v59  ;;  %v642_v7 = vadd.f32 %v641_v2, %v611_v1 }
 0x104   : > { %v1554_v4 = vpop.f32.mrf.mxu2  ;;  %v1560_v10 = vpop.f32.mrf.mxu3 }
 0x105   : > { %v473_v5 = vpop.f32.mrf.mxu0  ;;  %v493_v6 = vpop.f32.mrf.mxu1  ;;  %558 = vst [vmem:[%s1471_s26 + $0xb0] sm:$0xff] %v1554_v4 }
 0x106   : > { %543 = vst [vmem:[%s1471_s26 + $0x38] sm:$0xff] %v473_v5  ;;  %v574_v8 = vadd.f32 %v573_v3, %v473_v5  ;;  %v612_v9 = vmul.f32 %v473_v5, %v473_v5 }
 0x107   : > { %551 = vst [vmem:[%s1471_s26 + $0x78] sm:$0xff] %v493_v6 }
 0x108   : > { %v575_v12 = vadd.f32 %v574_v8, %v1469_v25  ;;  %v643_v13 = vadd.f32 %v642_v7, %v612_v9  ;;  %566 = vst [vmem:[%s1471_s26 + $0xf0] sm:$0xff] %v1560_v10  ;;  %v617_v25 = vmul.f32 %v1517_v40, %v1517_v40 }
 0x10a   : > { %v576_v15 = vadd.f32 %v575_v12, %v1478_v28  ;;  %v644_v16 = vadd.f32 %v643_v13, %v613_v11 }
 0x10c   : > { %v577_v18 = vadd.f32 %v576_v15, %v1491_v32  ;;  %v645_v19 = vadd.f32 %v644_v16, %v614_v14  ;;  %v513_v20 = vpop.f32.mrf.mxu2  ;;  %v1584_v24 = vpop.f32.mrf.mxu3 }
 0x10d   : > { %559 = vst [vmem:[%s1471_s26 + $0xb8] sm:$0xff] %v513_v20 }
 0x10e   : > { %v646_v22 = vadd.f32 %v645_v19, %v615_v17  ;;  %v578_v23 = vadd.f32 %v577_v18, %v1504_v36  ;;  %567 = vst [vmem:[%s1471_s26 + $0xf8] sm:$0xff] %v1584_v24 }
 0x110   : > { %v579_v27 = vadd.f32 %v578_v23, %v1517_v40  ;;  %v647_v28 = vadd.f32 %v646_v22, %v616_v21 }
 0x111   : > { %1202 = shalt.err (!%p1199_p10)
}
 0x112   : > { %s1310_s21 = smov 128   ;;  %s1311_s26 = smov 8   ;;  %v618_v31 = vmul.f32 %v1530_v44, %v1530_v44  ;;  %v580_v32 = vadd.f32 %v579_v27, %v1530_v44  ;;  %v648_v35 = vadd.f32 %v647_v28, %v617_v25  ;;  %v619_v39 = vmul.f32 %v1543_v55, %v1543_v55 }
 0x113   : > { %1050 = dma.vmem_to_hbm [thread:$0]  (%p1408_p3), %s1578_s28, 4096, %s702_s6, %s677_s11, %s1310_s21, %s1310_s21, %s1311_s26   ;;  %v620_v47 = vmul.f32 %v493_v6, %v493_v6  ;;  %v621_v48 = vmul.f32 %v1476_v26, %v1476_v26  ;;  %v622_v51 = vmul.f32 %v1489_v30, %v1489_v30  ;;  %v623_v54 = vmul.f32 %v1502_v34, %v1502_v34 }
 0x114   : > { %v581_v36 = vadd.f32 %v580_v32, %v1543_v55  ;;  %v649_v40 = vadd.f32 %v648_v35, %v618_v31  ;;  %v624_v57 = vmul.f32 %v1515_v38, %v1515_v38  ;;  %v626_v63 = vmul.f32 %v1541_v53, %v1541_v53  ;;  %s887_s30 = sshll.u32 %s1438_s10, 3  ;;  %s990_s5 = sshll.u32 %s1358_s19, 3 }
 0x115   : > { %v627_v2 = vmul.f32 %v1554_v4, %v1554_v4  ;;  %v628_v5 = vmul.f32 %v513_v20, %v513_v20  ;;  %v630_v8 = vmul.f32 %v1496_v33, %v1496_v33  ;;  %v631_v11 = vmul.f32 %v1509_v37, %v1509_v37  ;;  %s714_s28 = scalar_lea.hbm %s1713_s3, %s990_s5  ;;  %s681_s6 = sand.u32 1, %s1358_s19  }
 0x116   : > { %v650_v43 = vadd.f32 %v649_v40, %v619_v39  ;;  %v582_v46 = vadd.f32 %v581_v36, %v493_v6  ;;  %v629_v6 = vmul.f32 %v1483_v29, %v1483_v29  ;;  %v632_v13 = vmul.f32 %v1522_v41, %v1522_v41  ;;  %s728_s12 = scalar_lea.hbm %s1714_s4, %s990_s5  ;;  %s245_s14 = scalar_lea.vmem [#allocation8], %s887_s30 }
 0x117   : > { %v633_v15 = vmul.f32 %v1535_v45, %v1535_v45  ;;  %s716_s23 = sshll.u32 %s245_s14, 4  ;;  %s718_s25 = sshll.u32 %s714_s28, 4  ;;  %s717_s23 = int_to_ptr.vmem [resolvable:$true] %s716_s23  ;;  %s719_s25 = int_to_ptr.hbm [resolvable:$true] %s718_s25 }
 0x118   : > { %v583_v49 = vadd.f32 %v582_v46, %v1476_v26  ;;  %v651_v50 = vadd.f32 %v650_v43, %v620_v47  ;;  %v625_v26 = vmul.f32 %v1528_v42, %v1528_v42  ;;  %s732_s10 = sshll.u32 %s728_s12, 4  ;;  %s252_s20 = scalar_lea.vmem [#allocation10], %s887_s30  ;;  %s1665_s10 = int_to_ptr.hbm [resolvable:$true] %s732_s10 }
 0x119   : > { %s730_s7 = sshll.u32 %s252_s20, 4  ;;  %s682_s19 = scalar_lea.sflag [#allocation9], %s681_s6  ;;  %s1663_s7 = int_to_ptr.vmem [resolvable:$true] %s730_s7 }
 0x11a   : > { %v584_v44 = vadd.f32 %v583_v49, %v1489_v30  ;;  %v652_v52 = vadd.f32 %v651_v50, %v621_v48  ;;  %s1217_s21 = sshra.s32 %s719_s25, 4  ;;  %s1223_s24 = scalar_lea.hbm %s1713_s3, 16  ;;  %s1218_s21 = int_to_ptr.hbm [resolvable:$true] %s1217_s21 }
 0x11b   : > { %s1219_s26 = scalar_lea.hbm %s1218_s21, 8  ;;  %p1224_p5 = scmp.lt.s32.totalorder %s1218_s21, %s1713_s3 }
 0x11c   : > { %v585_v55 = vadd.f32 %v584_v44, %v1502_v34  ;;  %v653_v56 = vadd.f32 %v652_v52, %v622_v51  ;;  %p1220_p12 = scmp.ne.s32.totalorder %s1218_s21, %s1219_s26  ;;  %p1225_p7 = scmp.lt.s32.totalorder %s1223_s24, %s1219_s26 }
 0x11e   : > { %v654_v58 = vadd.f32 %v653_v56, %v623_v54  ;;  %v586_v60 = vadd.f32 %v585_v55, %v1515_v38  ;;  %p1221_p13 = pnand %p1220_p12, %p1408_p3  ;;  %p1226_p1 = por %p1225_p7, %p1224_p5 }
 0x120   : > { %v587_v61 = vadd.f32 %v586_v60, %v1528_v42  ;;  %v655_v62 = vadd.f32 %v654_v58, %v624_v57  ;;  %p1222_p0 = pneg %p1221_p13 }
 0x122   : > { %v588_v30 = vadd.f32 %v587_v61, %v1541_v53  ;;  %v656_v0 = vadd.f32 %v655_v62, %v625_v26  ;;  %p1227_p4 = pnand %p1226_p1, %p1222_p0 }
 0x124   : > { %v657_v34 = vadd.f32 %v656_v0, %v626_v63  ;;  %v589_v1 = vadd.f32 %v588_v30, %v1554_v4 }
 0x126   : > { %v658_v3 = vadd.f32 %v657_v34, %v627_v2  ;;  %v590_v38 = vadd.f32 %v589_v1, %v513_v20 }
 0x128   : > { %v591_v42 = vadd.f32 %v590_v38, %v1483_v29  ;;  %v659_v7 = vadd.f32 %v658_v3, %v628_v5 }
 0x12a   : > { %v592_v53 = vadd.f32 %v591_v42, %v1496_v33  ;;  %v660_v9 = vadd.f32 %v659_v7, %v629_v6 }
 0x12c   : > { %v593_v4 = vadd.f32 %v592_v53, %v1509_v37  ;;  %v661_v12 = vadd.f32 %v660_v9, %v630_v8  ;;  %v634_v37 = vmul.f32 %v1548_v59, %v1548_v59 }
 0x12e   : > { %v662_v14 = vadd.f32 %v661_v12, %v631_v11  ;;  %v594_v29 = vadd.f32 %v593_v4, %v1522_v41  ;;  %v635_v41 = vmul.f32 %v1560_v10, %v1560_v10 }
 0x130   : > { %v595_v33 = vadd.f32 %v594_v29, %v1535_v45  ;;  %v663_v16 = vadd.f32 %v662_v14, %v632_v13  ;;  %v636_v45 = vmul.f32 %v1584_v24, %v1584_v24 }
 0x132   : > { %v596_v17 = vadd.f32 %v595_v33, %v1548_v59  ;;  %v664_v18 = vadd.f32 %v663_v16, %v633_v15 }
 0x134   : > { %v665_v19 = vadd.f32 %v664_v18, %v634_v37  ;;  %v597_v20 = vadd.f32 %v596_v17, %v1560_v10 }
 0x136   : > { %v666_v21 = vadd.f32 %v665_v19, %v635_v41  ;;  %v598_v22 = vadd.f32 %v597_v20, %v1584_v24 }
 0x138   : > { %v599_v23 = vrot.slane %v598_v22, 4  ;;  %v667_v25 = vadd.f32 %v666_v21, %v636_v45 }
 0x13a   : > { %v600_v27 = vadd.f32 %v599_v23, %v598_v22  ;;  %v668_v59 = vrot.slane %v667_v25, 4 }
 0x13c   : > { %v601_v28 = vrot.slane %v600_v27, 2  ;;  %v669_v31 = vadd.f32 %v668_v59, %v667_v25 }
 0x13e   : > { %v602_v10 = vadd.f32 %v601_v28, %v600_v27  ;;  %v670_v32 = vrot.slane %v669_v31, 2 }
 0x140   : > { %v603_v24 = vrot.slane %v602_v10, 1  ;;  %v671_v35 = vadd.f32 %v670_v32, %v669_v31 }
 0x142   : > { %v604_v36 = vadd.f32 %v603_v24, %v602_v10  ;;  %v672_v39 = vrot.slane %v671_v35, 1 }
 0x144   : > { %v673_v40 = vadd.f32 %v672_v39, %v671_v35  ;;  %674 = vst [vmem:[%s245_s14] sm:$0xff] %v604_v36 }
 0x145   : > { %1230 = shalt.err (!%p1227_p4)
}
 0x146   : > { %1051 = dma.vmem_to_hbm [thread:$0]  (%p1408_p3), %s717_s23, 128, %s719_s25, %s682_s19   ;;  %675 = vst [vmem:[%s252_s20] sm:$0xff] %v673_v40 }
 0x147   : > { %s1245_s6 = sshra.s32 %s1665_s10, 4  ;;  %s1251_s14 = scalar_lea.hbm %s1714_s4, 16  ;;  %s1246_s6 = int_to_ptr.hbm [resolvable:$true] %s1245_s6 }
 0x148   : > { %s1247_s11 = scalar_lea.hbm %s1246_s6, 8  ;;  %p1252_p2 = scmp.lt.s32.totalorder %s1246_s6, %s1714_s4 }
 0x149   : > { %p1248_p8 = scmp.ne.s32.totalorder %s1246_s6, %s1247_s11  ;;  %p1253_p10 = scmp.lt.s32.totalorder %s1251_s14, %s1247_s11 }
 0x14b   : > { %p1249_p11 = pnand %p1248_p8, %p1408_p3  ;;  %p1254_p12 = por %p1253_p10, %p1252_p2 }
 0x14d   : > { %p1250_p9 = pneg %p1249_p11 }
 0x14f   : > { %p1255_p13 = pnand %p1254_p12, %p1250_p9 }
 0x151   : > { %1258 = shalt.err (!%p1255_p13)
}
 0x152   : > { %1052 = dma.vmem_to_hbm [thread:$0]  (%p1408_p3), %s1663_s7, 128, %s1665_s10, %s682_s19  }
 0x153 PF: > { %s744_s23 = sand.u32 1, %s1293_s15   ;;  %p1721_p0 = scmp.ge.s32.totalorder %s1305_s18, 2 }
 0x154   : > { %s745_s25 = scalar_lea.sflag [#allocation4], %s744_s23 }
 0x155   : > { %p1065_p5 = pnand %p1721_p0, %p1374_p6 }
 0x157   : > { %p1066_p7 = pneg %p1065_p5 }
 0x159   : > { %1284 = dma.done.wait (%p1066_p7), %s745_s25, 4096  }
 0x15a   : > { %1286 = vsyncadd (%p1066_p7), %s745_s25, 4294963200  ;;  %s1722_s20 = sadd.s32 4294967294, %s1305_s18  }
 0x15b   : > { %s754_s30 = sand.u32 1, %s1722_s20  }
 0x15c   : > { %s755_s5 = scalar_lea.sflag [#allocation9], %s754_s30 }
 0x15d   : > { %1288 = dma.done.wait (%p1066_p7), %s755_s5, 256  }
 0x15e   : > { %1290 = vsyncadd (%p1066_p7), %s755_s5, 4294967040  ;;  %p22_p3 = scmp.ge.s32.totalorder %s1392_s29, 4   ;;  %s1723_s15 = smov %s1297_s16 }
 0x15f   : > { %s1724_s16 = smov %s1301_s17  ;;  %s1725_s17 = smov %s1404_s8 }
 0x160   : > { %s1726_s18 = smov %s1392_s29  ;;  %24 = sbr.rel (!%p22_p3) target bundleno = 8 (0x8), region = 109 }
 0x165   :  { %771 = vsyncpa [#allocation3], 1 }
 0x166   :  { %773 = vsyncpa [#allocation3 + $0x1], 1 }
 0x167   :  { %774 = vsyncpa [#allocation6], 1 }
 0x168   :  { %775 = vsyncpa [#allocation4], 1 }
 0x169   :  { %777 = vsyncpa [#allocation4 + $0x1], 1 }
 0x16a   :  { %778 = vsyncpa [#allocation9], 1 }
 0x16b   :  { %780 = vsyncpa [#allocation9 + $0x1], 1 }

</bundles_post_ra>
